<compile_context>
chip_gen: v6e
topology: v6e:2x2x1
jax: 0.10.0
libtpu: 0.0.40
codegen_flags: <defaults>
</compile_context>

<pallas_src>
import functools

import jax
import jax.numpy as jnp
from jax.experimental import pallas as pl
from jax.experimental.pallas import tpu as pltpu


def _round_up(x, m):
    return (x + m - 1) // m * m


# ---------------------------------------------------------------------------
# Kernel 0: feature transform (prologue):  XW1_tile = X_tile @ W1
#   X_tile [TM, Fp] bf16, W1 [Fp, Hp] bf16 -> [TM, Hp] bf16 (f32 MXU accumulation)
# ---------------------------------------------------------------------------
def feature_transform_kernel(x_ref, w_ref, o_ref):
    o_ref[...] = jnp.dot(
        x_ref[...], w_ref[...], preferred_element_type=jnp.float32
    ).astype(o_ref.dtype)


# ---------------------------------------------------------------------------
# Kernel 1: layer-1 aggregation, k-tiled over the N contraction, fused with the
# layer-2 feature transform:
#   acc += A[i,k] @ XW1[k]            (f32 accumulator in VMEM scratch)
#   at k==last:  H = relu(acc + b1)   (dropout: eval-mode identity)
#                HW2[i] = H @ W2      (bf16 out; H never touches HBM)
# ---------------------------------------------------------------------------
def gcn_agg1_kernel(a_ref, xw1_ref, b1_ref, w2_ref, hw2_ref, acc_ref):
    k = pl.program_id(1)

    @pl.when(k == 0)
    def _():
        acc_ref[...] = jnp.zeros_like(acc_ref)

    acc_ref[...] += jnp.dot(
        a_ref[...], xw1_ref[...], preferred_element_type=jnp.float32
    )

    @pl.when(k == pl.num_programs(1) - 1)
    def _():
        h = jnp.maximum(acc_ref[...] + b1_ref[...], 0.0)
        # F.dropout(h, p, training=self.training): eval mode -> identity
        hw2_ref[...] = jnp.dot(
            h.astype(jnp.bfloat16), w2_ref[...], preferred_element_type=jnp.float32
        ).astype(hw2_ref.dtype)


# ---------------------------------------------------------------------------
# Kernel 2: layer-2 aggregation (k-tiled) + bias + log_softmax epilogue:
#   acc += A[i,k] @ HW2[k]
#   at k==last: z = acc + b2; padded class columns masked to -inf so the
#   normalization is exact; lane-dense [TM, Cp] f32 store.
# ---------------------------------------------------------------------------
def gcn_agg2_kernel(a_ref, hw2_ref, b2_ref, out_ref, acc_ref, *, num_classes):
    k = pl.program_id(1)

    @pl.when(k == 0)
    def _():
        acc_ref[...] = jnp.zeros_like(acc_ref)

    acc_ref[...] += jnp.dot(
        a_ref[...], hw2_ref[...], preferred_element_type=jnp.float32
    )

    @pl.when(k == pl.num_programs(1) - 1)
    def _():
        z = acc_ref[...] + b2_ref[...]
        col = jax.lax.broadcasted_iota(jnp.int32, z.shape, 1)
        z = jnp.where(col < num_classes, z, -jnp.inf)
        m = jnp.max(z, axis=1, keepdims=True)
        s = z - m
        lse = jnp.log(jnp.sum(jnp.exp(s), axis=1, keepdims=True))
        # NOTE: padded class columns hold -inf; wrapper slices [:n, :c].
        out_ref[...] = s - lse


# ---------------------------------------------------------------------------
# Wrapper: pad feature/class dims to 128-lane multiples, cast MXU operands to
# bf16, run prologue + two k-tiled aggregation pallas_calls, slice padding off.
# a_hat_p must already be padded/normalized (see normalized_adjacency_padded).
# ---------------------------------------------------------------------------
def gcn_forward(a_hat_p, x, w1, b1, w2, b2, *, tm=128, tk=128):
    n, fin = x.shape
    hid = w1.shape[1]
    c = w2.shape[1]
    np_ = a_hat_p.shape[0]
    assert np_ % tm == 0 and np_ % tk == 0, "padded N must divide the tile sizes"

    fin_p = _round_up(fin, 128)
    hid_p = _round_up(hid, 128)
    c_p = _round_up(c, 128)

    # Small operands: pad + cast (A_hat, the HBM-heavy one, arrives pre-padded).
    x_p = jnp.pad(x.astype(jnp.bfloat16), ((0, np_ - n), (0, fin_p - fin)))
    w1_p = jnp.pad(w1.astype(jnp.bfloat16), ((0, fin_p - fin), (0, hid_p - hid)))
    b1_p = jnp.pad(b1, (0, hid_p - hid)).reshape(1, hid_p).astype(jnp.float32)
    w2_p = jnp.pad(w2.astype(jnp.bfloat16), ((0, hid_p - hid), (0, c_p - c)))
    b2_p = jnp.pad(b2, (0, c_p - c)).reshape(1, c_p).astype(jnp.float32)

    row_cparams = pltpu.CompilerParams(dimension_semantics=("parallel",))
    agg_cparams = pltpu.CompilerParams(
        dimension_semantics=("parallel", "arbitrary")
    )

    # ---- prologue: XW1 = X @ W1  (tiny [N,fin]x[fin,hid] matmul, row-tiled) ----
    xw1 = pl.pallas_call(
        feature_transform_kernel,
        out_shape=jax.ShapeDtypeStruct((np_, hid_p), jnp.bfloat16),
        grid=(np_ // tm,),
        in_specs=[
            pl.BlockSpec((tm, fin_p), lambda i: (i, 0)),
            pl.BlockSpec((fin_p, hid_p), lambda i: (0, 0)),
        ],
        out_specs=pl.BlockSpec((tm, hid_p), lambda i: (i, 0)),
        compiler_params=row_cparams,
        cost_estimate=pl.CostEstimate(
            flops=2 * np_ * fin_p * hid_p,
            transcendentals=0,
            bytes_accessed=2 * (np_ * fin_p + fin_p * hid_p + np_ * hid_p),
        ),
    )(x_p, w1_p)

    grid = (np_ // tm, np_ // tk)

    # ---- layer 1 (+ fused W2 transform): HW2 = relu(A @ XW1 + b1) @ W2 ----
    hw2 = pl.pallas_call(
        gcn_agg1_kernel,
        out_shape=jax.ShapeDtypeStruct((np_, c_p), jnp.bfloat16),
        grid=grid,
        in_specs=[
            pl.BlockSpec((tm, tk), lambda i, k: (i, k)),      # A tile (streamed)
            pl.BlockSpec((tk, hid_p), lambda i, k: (k, 0)),   # XW1 k-tile
            pl.BlockSpec((1, hid_p), lambda i, k: (0, 0)),    # b1 (tiny)
            pl.BlockSpec((hid_p, c_p), lambda i, k: (0, 0)),  # W2 (tiny)
        ],
        out_specs=pl.BlockSpec((tm, c_p), lambda i, k: (i, 0)),
        scratch_shapes=[pltpu.VMEM((tm, hid_p), jnp.float32)],
        compiler_params=agg_cparams,
        cost_estimate=pl.CostEstimate(
            flops=2 * np_ * np_ * hid_p + 2 * np_ * hid_p * c_p,
            transcendentals=0,
            bytes_accessed=2 * (np_ * np_ + np_ * hid_p + hid_p * c_p + np_ * c_p)
            + 4 * hid_p,
        ),
    )(a_hat_p, xw1, b1_p, w2_p)

    # ---- layer 2 + log_softmax: out = log_softmax(A @ HW2 + b2, axis=1) ----
    out_p = pl.pallas_call(
        functools.partial(gcn_agg2_kernel, num_classes=c),
        out_shape=jax.ShapeDtypeStruct((np_, c_p), jnp.float32),
        grid=grid,
        in_specs=[
            pl.BlockSpec((tm, tk), lambda i, k: (i, k)),      # A tile (streamed)
            pl.BlockSpec((tk, c_p), lambda i, k: (k, 0)),     # HW2 k-tile
            pl.BlockSpec((1, c_p), lambda i, k: (0, 0)),      # b2 (tiny)
        ],
        out_specs=pl.BlockSpec((tm, c_p), lambda i, k: (i, 0)),  # lane-dense store
        scratch_shapes=[pltpu.VMEM((tm, c_p), jnp.float32)],
        compiler_params=agg_cparams,
        cost_estimate=pl.CostEstimate(
            flops=2 * np_ * np_ * c_p,
            transcendentals=np_ * c_p,
            bytes_accessed=2 * (np_ * np_ + np_ * c_p) + 4 * (c_p + np_ * c_p),
        ),
    )(a_hat_p, hw2, b2_p)

    return out_p[:n, :c]


# ---------------------------------------------------------------------------
# Glue (plain JAX): dense normalized adjacency built DIRECTLY at padded size
# in bf16 (avoids an extra N^2 pad copy of the HBM-dominant operand).
#   A_hat = D^{-1/2} (A + I) D^{-1/2},  A[i, j] = 1 iff edge j -> i
#   (source_to_target flow, as in PyG GCNConv).  Padding rows/cols are zero.
# NOTE: .at[dst, src].add(1.0) double-counts duplicate edges unless edge_index
# is coalesced (PyG coalesces); wrapper-side concern only.
# ---------------------------------------------------------------------------
def normalized_adjacency_padded(edge_index, num_nodes, padded_nodes):
    src = edge_index[0]
    dst = edge_index[1]
    loop = jnp.arange(num_nodes, dtype=edge_index.dtype)
    src = jnp.concatenate([src, loop])
    dst = jnp.concatenate([dst, loop])
    a = jnp.zeros((padded_nodes, padded_nodes), jnp.float32).at[dst, src].add(1.0)
    deg = a.sum(axis=1)
    dinv = jnp.where(deg > 0, jax.lax.rsqrt(deg), 0.0)
    a_hat = dinv[:, None] * a * dinv[None, :]
    return a_hat.astype(jnp.bfloat16)


# ---------------------------------------------------------------------------
# Deterministic parameter init (glorot weights, zero bias — like GCNConv).
# ---------------------------------------------------------------------------
def init_params(key, in_channels, hidden_channels, out_channels):
    k1, k2 = jax.random.split(key)

    def glorot(k, fan_in, fan_out):
        limit = jnp.sqrt(6.0 / (fan_in + fan_out))
        return jax.random.uniform(k, (fan_in, fan_out), jnp.float32, -limit, limit)

    w1 = glorot(k1, in_channels, hidden_channels)
    b1 = jnp.zeros((hidden_channels,), jnp.float32)
    w2 = glorot(k2, hidden_channels, out_channels)
    b2 = jnp.zeros((out_channels,), jnp.float32)
    return w1, b1, w2, b2


# Pure-JAX reference (eval mode), same operand precision as the kernels.
def gcn_reference(a_hat_f32, x, w1, b1, w2, b2):
    h = jnp.maximum(a_hat_f32 @ (x @ w1) + b1, 0.0)
    z = a_hat_f32 @ (h @ w2) + b2
    return jax.nn.log_softmax(z, axis=1)


if __name__ == "__main__":
    # Small, module-consistent shapes: N=200 nodes, in=16, hidden=32, out=4 classes.
    # Padded internally to Np=256, F/H/C=128; tiles TM=TK=128 -> grid (2, 2).
    N, IN_C, HID_C, OUT_C, E = 200, 16, 32, 4, 400
    TM = TK = 128
    NP = _round_up(N, max(TM, TK))

    key = jax.random.PRNGKey(0)
    kx, ke, kp = jax.random.split(key, 3)

    x = jax.random.normal(kx, (N, IN_C), jnp.float32)

    # Random undirected edge list -> edge_index [2, 2E]
    src = jax.random.randint(ke, (E,), 0, N, dtype=jnp.int32)
    dst = (src + 1 + jax.random.randint(jax.random.fold_in(ke, 1), (E,), 0, N - 1,
                                        dtype=jnp.int32)) % N
    edge_index = jnp.stack(
        [jnp.concatenate([src, dst]), jnp.concatenate([dst, src])], axis=0
    )

    w1, b1, w2, b2 = init_params(kp, IN_C, HID_C, OUT_C)

    a_hat_p = normalized_adjacency_padded(edge_index, N, NP)   # bf16, padded

    out = gcn_forward(a_hat_p, x, w1, b1, w2, b2, tm=TM, tk=TK)
    out = jax.block_until_ready(out)
    assert out.shape == (N, OUT_C)

    # Sanity 1: log_softmax rows exp-sum to 1 (normalization is f32 + masked padding).
    row_sums = jnp.exp(out).sum(axis=1)
    assert bool(jnp.allclose(row_sums, 1.0, atol=1e-4)), row_sums

    # Sanity 2: matches a pure-JAX reference built from the same bf16-cast operands
    # (remaining deviation comes from in-kernel bf16 re-casts; tolerance-aware).
    ref = gcn_reference(
        a_hat_p[:N, :N].astype(jnp.float32),
        x.astype(jnp.bfloat16).astype(jnp.float32),
        w1.astype(jnp.bfloat16).astype(jnp.float32), b1,
        w2.astype(jnp.bfloat16).astype(jnp.float32), b2,
    )
    max_err = float(jnp.max(jnp.abs(out - ref)))
    assert max_err < 1e-1, f"max abs error vs reference: {max_err}"

    print("KERNEL_OK")
</pallas_src>

<mosaic_0001>
module attributes {stable_mosaic.version = 11 : i64} {
  func.func @feature_transform_kernel(%arg0: i32, %arg1: memref<128x128xbf16, #tpu.memory_space<vmem>>, %arg2: memref<128x128xbf16, #tpu.memory_space<vmem>>, %arg3: memref<128x128xbf16, #tpu.memory_space<vmem>>) attributes {dimension_semantics = [#tpu.dimension_semantics<parallel>], iteration_bounds = array<i64: 2>, scalar_prefetch = 0 : i64, scratch_operands = 0 : i64, tpu.core_type = #tpu.core_type<tc>, window_params = [{transform_indices = @transform_0, window_bounds = array<i64: 128, 128>}, {pipeline_mode = #tpu.pipeline_mode<synchronous>, transform_indices = @transform_1, window_bounds = array<i64: 128, 128>}, {transform_indices = @transform_2, window_bounds = array<i64: 128, 128>}]} {
    %c0 = arith.constant 0 : index
    %c0_0 = arith.constant 0 : index
    %0 = vector.load %arg1[%c0, %c0_0] : memref<128x128xbf16, #tpu.memory_space<vmem>>, vector<128x128xbf16>
    %c0_1 = arith.constant 0 : index
    %c0_2 = arith.constant 0 : index
    %1 = vector.load %arg2[%c0_1, %c0_2] : memref<128x128xbf16, #tpu.memory_space<vmem>>, vector<128x128xbf16>
    %cst = arith.constant dense<0.000000e+00> : vector<128x128xf32>
    %2 = tpu.matmul %0, %1, %cst {dimension_numbers = #tpu.dot_dimension_numbers<[1], [0], [0], [1], [0, 0, 1, 1], [], []>} : vector<128x128xbf16>, vector<128x128xbf16>, vector<128x128xf32> -> vector<128x128xf32>
    %3 = arith.truncf %2 : vector<128x128xf32> to vector<128x128xbf16>
    %c0_3 = arith.constant 0 : index
    %c0_4 = arith.constant 0 : index
    %4 = vector.load %arg3[%c0_3, %c0_4] : memref<128x128xbf16, #tpu.memory_space<vmem>>, vector<128x128xbf16>
    tpu.vector_store %arg3[%c0_3, %c0_4], %3 {strides = array<i32>} : memref<128x128xbf16, #tpu.memory_space<vmem>>, vector<128x128xbf16>,
    return
  }
  func.func @transform_0(%arg0: i32) -> (i32, i32) {
    %c0_i32 = arith.constant 0 : i32
    %c0_i32_0 = arith.constant 0 : i32
    return %arg0, %c0_i32 : i32, i32
  }
  func.func @transform_1(%arg0: i32) -> (i32, i32) {
    %c0_i32 = arith.constant 0 : i32
    %c0_i32_0 = arith.constant 0 : i32
    %c0_i32_1 = arith.constant 0 : i32
    return %c0_i32, %c0_i32_0 : i32, i32
  }
  func.func @transform_2(%arg0: i32) -> (i32, i32) {
    %c0_i32 = arith.constant 0 : i32
    %c0_i32_0 = arith.constant 0 : i32
    return %arg0, %c0_i32 : i32, i32
  }
}

</mosaic_0001>

<bundles_post_ra>
// kernel: tpu_custom_call.1
= control target key start
LH: loop header
LB: loop body
LE: loop exit
PB: predicated region body
PF: predicated region fallthrough
CT: control target
= control target key end

     0   :  { %7 = vsyncpa [#allocation3], 0  ;;  %s1179_s0 = inlined_call_operand.hbm [shape: bf16[256,128], index: 0, kind: input, shape index: {}]   ;;  %s1180_s1 = inlined_call_operand.hbm [shape: bf16[128,128], index: 1, kind: input, shape index: {}]   ;;  %s1181_s2 = inlined_call_operand.hbm [shape: bf16[256,128], index: 2, kind: output, shape index: {}]  }
   0x1   :  { %9 = vsyncpa [#allocation3 + $0x1], 0 }
   0x2   :  { %10 = vsyncpa [#allocation6], 0 }
   0x3   :  { %11 = vsyncpa [#allocation4], 0 }
   0x4   :  { %13 = vsyncpa [#allocation4 + $0x1], 0  ;;  %s982_s9 = smov 0   ;;  %s984_s10 = smov 0  }
   0x5   :  { %s986_s11 = smov 0   ;;  %s988_s12 = smov 0  }
   0x6 LB: > { %s1003_s13 = sadd.s32 4294967295, %s958_s12   ;;  %s582_s14 = sadd.s32 4294967294, %s958_s12   ;;  %s958_s12 = sphi %s988_s12, %s1203_s12   ;;  %s954_s11 = sphi %s986_s11, %s1202_s11   ;;  %s950_s10 = sphi %s984_s10, %s1201_s10   ;;  %s946_s9 = sphi %s982_s9, %s1200_s9  }
   0x7   : > { %p39_p0 = scmp.ne.s32.totalorder %s950_s10, %s946_s9  ;;  %p1182_p1 = scmp.eq.s32.totalorder %s1003_s13, 0 }
   0x8   : > { %p90_p3 = scmp.eq.s32.totalorder %s582_s14, 1  ;;  %p583_p5 = scmp.ge.s32.totalorder %s958_s12, 1 }
   0x9   : > { %p1012_p4 = por %p1182_p1, %p39_p0  ;;  %p97_p7 = scmp.lt.s32.totalorder %s958_s12, 3 }
   0xa   : > { %p1017_p6 = por %p90_p3, %p39_p0  ;;  %s960_s18 = smov [#allocation5]  }
   0xb   : > { %s1186_s15 = scalar_select %p1012_p4, 1, 0 }
   0xc   : > { %s1187_s16 = scalar_select %p1017_p6, 1, 0 }
   0xd   : > { %p1022_p8 = pnand %p583_p5, %p97_p7  ;;  %s109_s19 = sshll.u32 %s960_s18, 4  ;;  %s110_s19 = int_to_ptr.vmem [resolvable:$true] %s109_s19 }
   0xe   : > { %s1036_s21 = sadd.s32 1, %s958_s12   ;;  %s26_s22 = sadd.s32 1, %s954_s11 }
   0xf   : > { %s1188_s17 = scalar_select %p1022_p8, 1, 0 }
  0x10   : > { %p767_p9 = pneg %p1022_p8  ;;  %s23_s23 = ssub.s32 %s958_s12, %s1036_s21 }
  0x11   : > { %s847_s24 = scalar_lea.vmem %s110_s19, 1024  ;;  %p855_p5 = scmp.lt.s32.totalorder %s110_s19, %s110_s19 }
  0x12   : > { %p1031_p11 = pnand %p767_p9, %p1182_p1  ;;  %p848_p13 = scmp.ne.s32.totalorder %s110_s19, %s847_s24 }
  0x13   : > { %p856_p7 = scmp.lt.s32.totalorder %s847_s24, %s847_s24 }
  0x14   : > { %p838_p12 = pneg %p1031_p11 }
  0x15   : > { %p857_p10 = por %p856_p7, %p855_p5 }
  0x16   : > { %p850_p0 = pnand %p848_p13, %p838_p12 }
  0x18   : > { %p851_p3 = pneg %p850_p0 }
  0x1a   : > { %p858_p2 = pnand %p857_p10, %p851_p3 }
  0x1c   : > { %861 = shalt.err (!%p858_p2)
}
  0x1d   : > { %s961_s25 = smov 64   ;;  %s962_s26 = smov 4  }
  0x1e   : > { %770 = dma.hbm_to_vmem [thread:$0]  (!%p1031_p11), %s1180_s1, 1024, %s110_s19, [#allocation6], %s961_s25, %s961_s25, %s962_s26  }
  0x1f   : > { %p24_p2 = scmp.eq.s32.totalorder %s23_s23, 0  ;;  %p33_p9 = scmp.ne.s32.totalorder %s954_s11, %s950_s10 }
  0x20   : > { %p34_p10 = scmp.eq.s32.totalorder %s958_s12, 0  ;;  %p780_p12 = scmp.lt.s32.totalorder %s958_s12, 2 }
  0x21   : > { %s1056_s29 = scalar_select %p24_p2, %s954_s11, %s26_s22  }
  0x22   : > { %p35_p13 = por %p34_p10, %p33_p9  ;;  %p1190_p0 = scmp.eq.s32.totalorder %s1003_s13, 1 }
  0x23   : > { %s123_s3 = sand.u32 1, %s954_s11   ;;  %s630_s4 = sshll.u32 %s958_s12, 10 }
  0x24   : > { %p1060_p3 = por %p1190_p0, %p33_p9  ;;  %s586_s5 = sshll.u32 %s123_s3, 6 }
  0x25   : > { %s1069_s8 = scalar_lea.hbm %s1179_s0, %s630_s4  ;;  %s127_s14 = scalar_lea.vmem [#allocation2], %s586_s5 }
  0x26   : > { %s1191_s30 = scalar_select %p1060_p3, 1, 0 }
  0x27   : > { %s134_s18 = sshll.u32 %s127_s14, 4  ;;  %p1071_p11 = pnand %p780_p12, %p35_p13  ;;  %s1075_s18 = int_to_ptr.vmem [resolvable:$true] %s134_s18 }
  0x28   : > { %s1077_s20 = scalar_lea.sflag [#allocation3], %s123_s3  ;;  %s862_s22 = scalar_lea.hbm %s1069_s8, 1024 }
  0x29   : > { %p863_p5 = scmp.ne.s32.totalorder %s1069_s8, %s862_s22  ;;  %p864_p7 = pneg %p1071_p11 }
  0x2a   : > { %s867_s27 = scalar_lea.hbm %s1179_s0, 2048  ;;  %p868_p10 = scmp.lt.s32.totalorder %s1069_s8, %s1179_s0 }
  0x2b   : > { %p865_p2 = pnand %p864_p7, %p863_p5  ;;  %p869_p12 = scmp.lt.s32.totalorder %s867_s27, %s862_s22 }
  0x2d   : > { %p866_p9 = pneg %p865_p2  ;;  %p870_p13 = por %p869_p12, %p868_p10 }
  0x2f   : > { %p871_p0 = pnand %p870_p13, %p866_p9 }
  0x31   : > { %874 = shalt.err (!%p871_p0)
}
  0x32   : > { %s875_s3 = scalar_lea.vmem %s1075_s18, 1024  ;;  %s963_s5 = smov [#allocation2]  }
  0x33   : > { %p876_p1 = scmp.ne.s32.totalorder %s1075_s18, %s875_s3  ;;  %s880_s6 = sshll.u32 %s963_s5, 4  ;;  %s881_s6 = int_to_ptr.vmem [resolvable:$false] %s880_s6 }
  0x34   : > { %s882_s7 = scalar_lea.vmem %s881_s6, 2048  ;;  %p883_p2 = scmp.lt.s32.totalorder %s1075_s18, %s881_s6 }
  0x35   : > { %p878_p6 = pnand %p876_p1, %p864_p7  ;;  %p884_p3 = scmp.lt.s32.totalorder %s882_s7, %s875_s3 }
  0x37   : > { %p879_p5 = pneg %p878_p6  ;;  %p885_p4 = por %p884_p3, %p883_p2 }
  0x39   : > { %p886_p8 = pnand %p885_p4, %p879_p5 }
  0x3b   : > { %889 = shalt.err (!%p886_p8)
}
  0x3c   : > { %774 = dma.hbm_to_vmem [thread:$0]  (!%p1071_p11), %s1069_s8, 1024, %s1075_s18, %s1077_s20, %s961_s25, %s961_s25, %s962_s26  }
  0x3d   : > { %p1193_p1 = scmp.ne.s32.totalorder %s1188_s17, 0 }
  0x3e   : > { %s1104_s14 = sand.u32 (!%p1193_p1), 1, %s950_s10   ;;  %p1194_p4 = scmp.ne.s32.totalorder (!%p1193_p1), %s1186_s15, 0 }
  0x3f   : > { %146 = sbr.rel (%p1193_p1) target bundleno = 328 (0x148), region = 28  ;;  %s590_s22 = sshll.u32 (!%p1193_p1), %s1104_s14, 6 }
  0x40   : > { %s149_s23 = scalar_lea.sflag (!%p1193_p1), [#allocation3], %s1104_s14  ;;  %s1110_s19 = scalar_lea.vmem (!%p1193_p1), [#allocation2], %s590_s22 }
  0x44   : > { %933 = dma.done.wait (%p1194_p4), %s149_s23, 1024  }
  0x45   : > { %935 = vsyncadd (%p1194_p4), %s149_s23, 4294966272  ;;  %p1195_p6 = scmp.eq.s32.totalorder %s1003_s13, 0 }
  0x47   : > { %937 = dma.done.wait (%p1195_p6), [#allocation6], 1024   ;;  %p1196_p8 = pmov %p1195_p6 }
  0x48   : > { %v820_v0 = vld [vmem:[#allocation5 + $0x38] sm:$0xff]   ;;  %v821_v1 = vld [vmem:[#allocation5 + $0x30] sm:$0xff]   ;;  %v822_v2 = vld [vmem:[#allocation5 + $0x28] sm:$0xff]   ;;  %s176_s15 = scalar_lea.vmem [#allocation7], %s590_s22  ;;  %s647_s25 = sshll.u32 %s1003_s13, 10 }
  0x49   : > { %939 = vsyncadd (%p1196_p8), [#allocation6], 4294966272  ;;  %711 = vmatprep.subr.bf16.mxu0 %v820_v0  ;;  %743 = vmatprep.subr.bf16.mxu1 %v820_v0  ;;  %v823_v3 = vld [vmem:[#allocation5 + $0x20] sm:$0xff]   ;;  %v824_v6 = vld [vmem:[#allocation5 + $0x18] sm:$0xff]   ;;  %s499_s17 = sshll.u32 %s176_s15, 4  ;;  %s1136_s18 = scalar_lea.hbm %s1181_s2, %s647_s25  ;;  %s1131_s17 = int_to_ptr.vmem [resolvable:$true] %s499_s17 }
  0x4a   : > { %712 = vmatpush3.bf16.msra.mxu0 %v820_v0  ;;  %751 = vmatpush3.bf16.msra.mxu1 %v820_v0  ;;  %v828_v4 = vld [vmem:[%s1110_s19] sm:$0xff]   ;;  %v825_v7 = vld [vmem:[#allocation5 + $0x10] sm:$0xff]   ;;  %v826_v8 = vld [vmem:[#allocation5 + $0x8] sm:$0xff]   ;;  %s486_s13 = scalar_lea.sflag [#allocation4], %s1104_s14  ;;  %s890_s20 = scalar_lea.vmem %s1131_s17, 1024 }
  0x4b   : > { %713 = vmatprep.subr.bf16.mxu0 %v821_v1  ;;  %744 = vmatprep.subr.bf16.mxu1 %v821_v1  ;;  %v829_v5 = vld [vmem:[%s1110_s19 + $0x20] sm:$0xff]   ;;  %v830_v10 = vld [vmem:[%s1110_s19 + $0x8] sm:$0xff]   ;;  %v832_v12 = vld [vmem:[%s1110_s19 + $0x10] sm:$0xff]   ;;  %p891_p3 = scmp.ne.s32.totalorder %s1131_s17, %s890_s20  ;;  %p1197_p11 = scmp.ne.s32.totalorder %s1191_s30, 0 }
  0x4c   : > { %727 = vmatprep.mubr.bf16.mxu0 %v828_v4  ;;  %735 = vmatprep.mubr.bf16.mxu1 %v829_v5  ;;  %v827_v9 = vld [vmem:[#allocation5] sm:$0xff]   ;;  %v831_v11 = vld [vmem:[%s1110_s19 + $0x28] sm:$0xff]   ;;  %v833_v13 = vld [vmem:[%s1110_s19 + $0x30] sm:$0xff]   ;;  %s964_s24 = smov [#allocation7]  }
  0x4d   : > { %v834_v14 = vld [vmem:[%s1110_s19 + $0x18] sm:$0xff]   ;;  %p892_p7 = pnand %p891_p3, %p1197_p11  ;;  %s894_s27 = sshll.u32 %s964_s24, 4  ;;  %s895_s27 = int_to_ptr.vmem [resolvable:$false] %s894_s27 }
  0x4e   : > { %714 = vmatpush3.bf16.msra.mxu0 %v821_v1  ;;  %752 = vmatpush3.bf16.msra.mxu1 %v821_v1  ;;  %v835_v15 = vld [vmem:[%s1110_s19 + $0x38] sm:$0xff]   ;;  %s896_s28 = scalar_lea.vmem %s895_s27, 2048  ;;  %p897_p10 = scmp.lt.s32.totalorder %s1131_s17, %s895_s27 }
  0x4f   : > { %715 = vmatprep.subr.bf16.mxu0 %v822_v2  ;;  %745 = vmatprep.subr.bf16.mxu1 %v822_v2  ;;  %p893_p9 = pneg %p892_p7  ;;  %p898_p12 = scmp.lt.s32.totalorder %s896_s28, %s890_s20 }
  0x51   : > { %p899_p13 = por %p898_p12, %p897_p10 }
  0x52   : > { %716 = vmatpush3.bf16.msra.mxu0 %v822_v2  ;;  %753 = vmatpush3.bf16.msra.mxu1 %v822_v2 }
  0x53   : > { %717 = vmatprep.subr.bf16.mxu0 %v823_v3  ;;  %746 = vmatprep.subr.bf16.mxu1 %v823_v3  ;;  %p900_p0 = pnand %p899_p13, %p893_p9 }
  0x56   : > { %718 = vmatpush3.bf16.msra.mxu0 %v823_v3  ;;  %754 = vmatpush3.bf16.msra.mxu1 %v823_v3 }
  0x57   : > { %719 = vmatprep.subr.bf16.mxu0 %v824_v6  ;;  %747 = vmatprep.subr.bf16.mxu1 %v824_v6 }
  0x5a   : > { %720 = vmatpush3.bf16.msra.mxu0 %v824_v6  ;;  %755 = vmatpush3.bf16.msra.mxu1 %v824_v6 }
  0x5b   : > { %721 = vmatprep.subr.bf16.mxu0 %v825_v7  ;;  %748 = vmatprep.subr.bf16.mxu1 %v825_v7 }
  0x5e   : > { %722 = vmatpush3.bf16.msra.mxu0 %v825_v7  ;;  %756 = vmatpush3.bf16.msra.mxu1 %v825_v7 }
  0x5f   : > { %723 = vmatprep.subr.bf16.mxu0 %v826_v8  ;;  %749 = vmatprep.subr.bf16.mxu1 %v826_v8 }
  0x62   : > { %724 = vmatpush3.bf16.msra.mxu0 %v826_v8  ;;  %757 = vmatpush3.bf16.msra.mxu1 %v826_v8 }
  0x63   : > { %725 = vmatprep.subr.bf16.mxu0 %v827_v9  ;;  %750 = vmatprep.subr.bf16.mxu1 %v827_v9 }
  0x66   : > { %726 = vmatpush3.bf16.msra.mxu0 %v827_v9  ;;  %758 = vmatpush3.bf16.msra.mxu1 %v827_v9 }
  0x69   : > { %728 = vmatmul.mubr.bf16.vlgmr.msra.gmra.mxu0 %v830_v10  ;;  %736 = vmatmul.mubr.bf16.vlgmr.msra.gmra.mxu1 %v831_v11 }
  0x6a   : > { %731 = vmatprep.mubr.bf16.mxu0 %v832_v12  ;;  %739 = vmatprep.mubr.bf16.mxu1 %v833_v13 }
  0x71   : > { %732 = vmatmul.mubr.bf16.gmra.mxu0 %v834_v14  ;;  %740 = vmatmul.mubr.bf16.gmra.mxu1 %v835_v15 }
 0x129   : > { %v729_v16 = vpop.f32.mrf.mxu0  ;;  %v737_v17 = vpop.f32.mrf.mxu1 }
 0x12b   : > { %v342_v18 = vpop.f32.mrf.mxu0  ;;  %v374_v19 = vpop.f32.mrf.mxu1 }
 0x12d   : > { %v730_v20 = vpop.f32.mrf.mxu0  ;;  %v738_v21 = vpop.f32.mrf.mxu1 }
 0x12e   : > { %v656_v22 = vpack.c.bf16 %v730_v20, %v729_v16  ;;  %v676_v23 = vpack.c.bf16 %v738_v21, %v737_v17 }
 0x12f   : > { %v345_v24 = vpop.f32.mrf.mxu0  ;;  %v377_v25 = vpop.f32.mrf.mxu1 }
 0x130   : > { %688 = vst [vmem:[%s176_s15 + $0x8] sm:$0xff] %v656_v22   ;;  %692 = vst [vmem:[%s176_s15 + $0x28] sm:$0xff] %v676_v23   ;;  %v651_v26 = vpack.c.bf16 %v345_v24, %v342_v18  ;;  %v671_v27 = vpack.c.bf16 %v377_v25, %v374_v19 }
 0x131   : > { %v733_v28 = vpop.f32.mrf.mxu0  ;;  %v741_v29 = vpop.f32.mrf.mxu1 }
 0x132   : > { %652 = vst [vmem:[%s176_s15] sm:$0xff] %v651_v26   ;;  %691 = vst [vmem:[%s176_s15 + $0x20] sm:$0xff] %v671_v27  }
 0x133   : > { %v358_v30 = vpop.f32.mrf.mxu0  ;;  %v390_v31 = vpop.f32.mrf.mxu1 }
 0x135   : > { %v734_v32 = vpop.f32.mrf.mxu0  ;;  %v742_v33 = vpop.f32.mrf.mxu1 }
 0x136   : > { %v666_v34 = vpack.c.bf16 %v734_v32, %v733_v28  ;;  %v686_v35 = vpack.c.bf16 %v742_v33, %v741_v29 }
 0x137   : > { %v361_v36 = vpop.f32.mrf.mxu0  ;;  %v393_v37 = vpop.f32.mrf.mxu1 }
 0x138   : > { %690 = vst [vmem:[%s176_s15 + $0x18] sm:$0xff] %v666_v34   ;;  %694 = vst [vmem:[%s176_s15 + $0x38] sm:$0xff] %v686_v35   ;;  %v661_v38 = vpack.c.bf16 %v361_v36, %v358_v30  ;;  %v681_v39 = vpack.c.bf16 %v393_v37, %v390_v31 }
 0x13a   : > { %689 = vst [vmem:[%s176_s15 + $0x10] sm:$0xff] %v661_v38   ;;  %693 = vst [vmem:[%s176_s15 + $0x30] sm:$0xff] %v681_v39  }
 0x13b   : > { %903 = shalt.err (!%p900_p0)
}
 0x13c   : > { %s904_s4 = scalar_lea.hbm %s1136_s18, 1024  ;;  %s908_s6 = scalar_lea.hbm %s1181_s2, 2048 }
 0x13d   : > { %p905_p5 = scmp.ne.s32.totalorder %s1136_s18, %s904_s4  ;;  %p909_p4 = scmp.lt.s32.totalorder %s1136_s18, %s1181_s2 }
 0x13e   : > { %p910_p6 = scmp.lt.s32.totalorder %s908_s6, %s904_s4 }
 0x13f   : > { %p906_p2 = pnand %p905_p5, %p1197_p11 }
 0x140   : > { %p911_p8 = por %p910_p6, %p909_p4 }
 0x141   : > { %p907_p1 = pneg %p906_p2 }
 0x143   : > { %p912_p3 = pnand %p911_p8, %p907_p1 }
 0x145   : > { %915 = shalt.err (!%p912_p3)
}
 0x146   : > { %s965_s23 = smov 64   ;;  %s966_s19 = smov 4  }
 0x147   : > { %765 = dma.vmem_to_hbm [thread:$0]  (%p1197_p11), %s1131_s17, 1024, %s1136_s18, %s486_s13, %s965_s23, %s965_s23, %s966_s19  }
 0x148 PF: > { %s514_s15 = sand.u32 1, %s946_s9   ;;  %p1198_p7 = scmp.ne.s32.totalorder %s1187_s16, 0 }
 0x149   : > { %p1199_p9 = scmp.ge.s32.totalorder %s958_s12, 2  ;;  %s515_s25 = scalar_lea.sflag [#allocation4], %s514_s15 }
 0x14b   : > { %p776_p10 = pnand %p1199_p9, %p1198_p7 }
 0x14d   : > { %p777_p12 = pneg %p776_p10 }
 0x14f   : > { %941 = dma.done.wait (%p777_p12), %s515_s25, 1024  }
 0x150   : > { %943 = vsyncadd (%p777_p12), %s515_s25, 4294966272  ;;  %p16_p13 = scmp.ge.s32.totalorder %s1036_s21, 4   ;;  %s1200_s9 = smov %s950_s10 }
 0x151   : > { %s1201_s10 = smov %s954_s11  ;;  %s1202_s11 = smov %s1056_s29 }
 0x152   : > { %s1203_s12 = smov %s1036_s21  ;;  %18 = sbr.rel (!%p16_p13) target bundleno = 6 (0x6), region = 77 }
 0x157   :  { %520 = vsyncpa [#allocation3], 1 }
 0x158   :  { %522 = vsyncpa [#allocation3 + $0x1], 1 }
 0x159   :  { %523 = vsyncpa [#allocation6], 1 }
 0x15a   :  { %524 = vsyncpa [#allocation4], 1 }
 0x15b   :  { %526 = vsyncpa [#allocation4 + $0x1], 1 }

</bundles_post_ra>
